<compile_context>
chip_gen: v6e
topology: v6e:2x2x1
jax: 0.10.0
libtpu: 0.0.40
codegen_flags: <defaults>
</compile_context>

<pallas_src>
import jax
import jax.numpy as jnp
import numpy as np
from jax.experimental import pallas as pl
from jax.experimental.pallas import tpu as pltpu

NEG_SLOPE = 0.01  # F.leaky_relu default negative slope
LANE = 128


def _round_up(v, m):
    return ((v + m - 1) // m) * m


def _make_kernel(E, compute_dtype):
    def kernel(x_ref, wt_ref, b_ref, ap_ref, wrt_ref, br_ref, o_ref):
        x = x_ref[...]
        # start the accumulator from the (lane-dense, zero-padded) readout bias
        acc = jnp.broadcast_to(br_ref[...], o_ref.shape)
        for e in range(E):  # static unroll: E is small, one program does the whole layer
            # Wh_x_e = leaky_relu(X @ W_e^T + b_e)
            z = jnp.dot(x, wt_ref[e], preferred_element_type=jnp.float32) + b_ref[e]
            wh = jnp.where(z >= 0, z, NEG_SLOPE * z)
            # x_e = A'[e] @ Wh_x_e   (mean-aggregation + cross term folded into A' on host)
            xe = jnp.dot(ap_ref[e], wh.astype(compute_dtype),
                         preferred_element_type=jnp.float32)
            # fused readout: this etype's slice of concat(x) @ W_readout^T
            acc = acc + jnp.dot(xe.astype(compute_dtype), wrt_ref[e],
                                preferred_element_type=jnp.float32)
        o_ref[...] = acc

    return kernel


def multidim_gcn_layer(x, A, W, b, Wr, br, M_att_w, alpha,
                       compute_dtype=jnp.float32):
    """
    x:       [N, IN]      node features
    A:       [E, N, N]    dense adjacency, A[e, dst, src] = 1.0 if src->dst edge of type e
    W, b:    [E, IN, IN], [E, IN]   per-etype nn.Linear(in, in)   (y = x @ W.T + b)
    Wr, br:  [OUT, E*IN], [OUT]     readout nn.Linear(in*E, out)
    M_att_w: [IN, IN]               M_att.weight (only enters through a softmax over a
                                    length-1 axis, which is identically 1 -> unused)
    """
    E, N, _ = A.shape
    IN = x.shape[1]
    OUT = Wr.shape[0]
    OUT_PAD = _round_up(OUT, LANE)  # lane-dense output slab; sliced back below
    f32 = jnp.float32
    itemsize = np.dtype(compute_dtype).itemsize

    # ---- host-side "glue" (weights only) -------------------------------------------
    # PyTorch: p_vec[e'] = trace(W_{e'}(W_e(M_att.weight)^T)); F.softmax on an [E, 1]
    # tensor uses the implicit dim=1 (length 1) -> p == 1 for every entry, hence
    #   cross_e = (sum_e' p[e']) * Wh_x_e * (1 - alpha) = E * (1 - alpha) * Wh_x_e.
    cross_scale = float(E) * (1.0 - float(alpha))
    del M_att_w  # only feeds the provably-constant softmax above

    # Fold alpha, the in-degree mean and the cross scale into the adjacency (in f32):
    #   A'[e] = alpha * deg_inv[e] * A[e] + cross_scale * I
    A = A.astype(f32)
    deg = jnp.sum(A, axis=2, keepdims=True)                                  # [E, N, 1]
    deg_inv = jnp.where(deg > 0, 1.0 / jnp.where(deg > 0, deg, 1.0), 0.0)
    A_fold = (float(alpha) * deg_inv * A
              + cross_scale * jnp.eye(N, dtype=f32)[None]).astype(compute_dtype)

    Wt = jnp.transpose(W, (0, 2, 1)).astype(compute_dtype)                   # [E, IN, IN]
    b3 = b.astype(f32)[:, None, :]                                           # [E, 1, IN]
    Wrt = jnp.transpose(Wr.astype(f32)).reshape(E, IN, OUT)                  # [E, IN, OUT]
    Wrt = jnp.pad(Wrt, ((0, 0), (0, 0), (0, OUT_PAD - OUT))).astype(compute_dtype)
    br2 = jnp.pad(br.astype(f32), (0, OUT_PAD - OUT))[None, :]               # [1, OUT_PAD]
    x = x.astype(compute_dtype)

    flops = 2 * N * IN * E * (IN + N + OUT_PAD)
    bytes_accessed = int(
        (N * IN + E * IN * IN + E * N * N + E * IN * OUT_PAD) * itemsize
        + (E * IN + OUT_PAD + N * OUT_PAD) * 4)

    kernel = _make_kernel(E, compute_dtype)
    out = pl.pallas_call(
        kernel,
        out_shape=jax.ShapeDtypeStruct((N, OUT_PAD), jnp.float32),
        grid=(1,),
        in_specs=[
            pl.BlockSpec((N, IN), lambda i: (0, 0)),              # x
            pl.BlockSpec((E, IN, IN), lambda i: (0, 0, 0)),       # W^T (all etypes)
            pl.BlockSpec((E, 1, IN), lambda i: (0, 0, 0)),        # per-etype bias
            pl.BlockSpec((E, N, N), lambda i: (0, 0, 0)),         # folded adjacency A'
            pl.BlockSpec((E, IN, OUT_PAD), lambda i: (0, 0, 0)),  # readout slices (padded)
            pl.BlockSpec((1, OUT_PAD), lambda i: (0, 0)),         # readout bias (padded)
        ],
        out_specs=pl.BlockSpec((N, OUT_PAD), lambda i: (0, 0)),   # lane-dense output slab
        compiler_params=pltpu.CompilerParams(dimension_semantics=("arbitrary",)),
        cost_estimate=pl.CostEstimate(flops=flops, transcendentals=0,
                                      bytes_accessed=bytes_accessed),
    )(x, Wt, b3, A_fold, Wrt, br2)
    return out[:, :OUT]


def reference(x, A, W, b, Wr, br, M_att_w, alpha):
    """Pure-JAX mirror of the PyTorch forward (including the degenerate softmax path)."""
    E, N, _ = A.shape
    parts = []
    for e in range(E):
        z = x @ W[e].T + b[e]
        wh = jnp.where(z >= 0, z, NEG_SLOPE * z)
        deg = A[e].sum(axis=1, keepdims=True)
        agg = jnp.where(deg > 0, (A[e] @ (alpha * wh)) / jnp.where(deg > 0, deg, 1.0), 0.0)
        t1 = M_att_w @ W[e].T + b[e][None, :]
        traces = jnp.stack([jnp.trace(t1.T @ W[ep].T + b[ep][None, :]) for ep in range(E)])
        p = jax.nn.softmax(traces.reshape(E, 1), axis=1)   # mirrors F.softmax implicit dim
        cross = jnp.sum(p) * wh * (1.0 - alpha)
        parts.append(cross + agg)
    xcat = jnp.concatenate(parts, axis=1)
    return xcat @ Wr.T + br[None, :]


if __name__ == "__main__":
    N, IN, OUT, E = 16, 32, 32, 3       # nodes, in_size, out_size, len(etypes); ntypes = 1
    alpha = 0.5

    key = jax.random.PRNGKey(0)
    ks = jax.random.split(key, 8)

    # deterministic synthetic parameters (PyTorch-Linear-style uniform init)
    lim_in = float(1.0 / np.sqrt(IN))
    lim_ro = float(1.0 / np.sqrt(IN * E))
    x = jax.random.normal(ks[0], (N, IN), jnp.float32)
    W = jax.random.uniform(ks[1], (E, IN, IN), jnp.float32, -lim_in, lim_in)
    b = jax.random.uniform(ks[2], (E, IN), jnp.float32, -lim_in, lim_in)
    M_att_w = jax.random.uniform(ks[3], (IN, IN), jnp.float32, -lim_in, lim_in)
    Wr = jax.random.uniform(ks[4], (OUT, E * IN), jnp.float32, -lim_ro, lim_ro)
    br = jax.random.uniform(ks[5], (OUT,), jnp.float32, -lim_ro, lim_ro)
    # synthetic multigraph: one dense adjacency per edge type
    A = (jax.random.uniform(ks[6], (E, N, N), jnp.float32) < 0.3).astype(jnp.float32)

    ref = reference(x, A, W, b, Wr, br, M_att_w, alpha)

    # f32 path: matches the PyTorch/JAX reference tightly.
    out = jax.block_until_ready(multidim_gcn_layer(x, A, W, b, Wr, br, M_att_w, alpha))
    np.testing.assert_allclose(np.asarray(out), np.asarray(ref), rtol=1e-4, atol=1e-4)

    # bf16 heavy operands (X, W^T, folded A', readout W) with f32 MXU accumulation:
    # halves the dominant HBM/VMEM traffic; checked at a correspondingly looser tolerance.
    out_bf16 = jax.block_until_ready(
        multidim_gcn_layer(x, A, W, b, Wr, br, M_att_w, alpha,
                           compute_dtype=jnp.bfloat16))
    np.testing.assert_allclose(np.asarray(out_bf16), np.asarray(ref), rtol=5e-2, atol=5e-2)

    print("KERNEL_OK")
</pallas_src>

<mosaic_0001>
module attributes {stable_mosaic.version = 11 : i64} {
  func.func @kernel(%arg0: i32, %arg1: memref<16x32xf32, #tpu.memory_space<vmem>>, %arg2: memref<3x32x32xf32, #tpu.memory_space<vmem>>, %arg3: memref<3x1x32xf32, #tpu.memory_space<vmem>>, %arg4: memref<3x16x16xf32, #tpu.memory_space<vmem>>, %arg5: memref<3x32x128xf32, #tpu.memory_space<vmem>>, %arg6: memref<1x128xf32, #tpu.memory_space<vmem>>, %arg7: memref<16x128xf32, #tpu.memory_space<vmem>>) attributes {dimension_semantics = [#tpu.dimension_semantics<arbitrary>], iteration_bounds = array<i64: 1>, scalar_prefetch = 0 : i64, scratch_operands = 0 : i64, tpu.core_type = #tpu.core_type<tc>, window_params = [{pipeline_mode = #tpu.pipeline_mode<synchronous>, transform_indices = @transform_0, window_bounds = array<i64: 16, 32>}, {pipeline_mode = #tpu.pipeline_mode<synchronous>, transform_indices = @transform_1, window_bounds = array<i64: 3, 32, 32>}, {pipeline_mode = #tpu.pipeline_mode<synchronous>, transform_indices = @transform_2, window_bounds = array<i64: 3, 1, 32>}, {pipeline_mode = #tpu.pipeline_mode<synchronous>, transform_indices = @transform_3, window_bounds = array<i64: 3, 16, 16>}, {pipeline_mode = #tpu.pipeline_mode<synchronous>, transform_indices = @transform_4, window_bounds = array<i64: 3, 32, 128>}, {pipeline_mode = #tpu.pipeline_mode<synchronous>, transform_indices = @transform_5, window_bounds = array<i64: 1, 128>}, {pipeline_mode = #tpu.pipeline_mode<synchronous>, transform_indices = @transform_6, window_bounds = array<i64: 16, 128>}]} {
    %c0 = arith.constant 0 : index
    %c0_0 = arith.constant 0 : index
    %0 = vector.load %arg1[%c0, %c0_0] : memref<16x32xf32, #tpu.memory_space<vmem>>, vector<16x32xf32>
    %c0_1 = arith.constant 0 : index
    %c0_2 = arith.constant 0 : index
    %1 = vector.load %arg6[%c0_1, %c0_2] : memref<1x128xf32, #tpu.memory_space<vmem>>, vector<1x128xf32>
    %2 = vector.shape_cast %1 : vector<1x128xf32> to vector<1x128xf32>
    %3 = vector.broadcast %2 : vector<1x128xf32> to vector<16x128xf32>
    %c0_3 = arith.constant 0 : index
    %c0_4 = arith.constant 0 : index
    %c0_5 = arith.constant 0 : index
    %4 = vector.load %arg2[%c0_3, %c0_4, %c0_5] : memref<3x32x32xf32, #tpu.memory_space<vmem>>, vector<1x32x32xf32>
    %5 = vector.shape_cast %4 : vector<1x32x32xf32> to vector<32x32xf32>
    %cst = arith.constant dense<0.000000e+00> : vector<16x32xf32>
    %6 = tpu.matmul %0, %5, %cst {dimension_numbers = #tpu.dot_dimension_numbers<[1], [0], [0], [1], [0, 0, 1, 1], [], []>} : vector<16x32xf32>, vector<32x32xf32>, vector<16x32xf32> -> vector<16x32xf32>
    %c0_6 = arith.constant 0 : index
    %c0_7 = arith.constant 0 : index
    %c0_8 = arith.constant 0 : index
    %7 = vector.load %arg3[%c0_6, %c0_7, %c0_8] : memref<3x1x32xf32, #tpu.memory_space<vmem>>, vector<1x1x32xf32>
    %8 = vector.shape_cast %7 : vector<1x1x32xf32> to vector<1x32xf32>
    %9 = vector.broadcast %8 : vector<1x32xf32> to vector<16x32xf32>
    %10 = arith.addf %6, %9 : vector<16x32xf32>
    %cst_9 = arith.constant 0.000000e+00 : f32
    %11 = vector.broadcast %cst_9 : f32 to vector<16x32xf32>
    %12 = arith.cmpf oge, %10, %11 : vector<16x32xf32>
    %cst_10 = arith.constant 0.00999999977 : f32
    %13 = vector.broadcast %cst_10 : f32 to vector<16x32xf32>
    %14 = arith.mulf %13, %10 : vector<16x32xf32>
    %15 = arith.select %12, %10, %14 : vector<16x32xi1>, vector<16x32xf32>
    %c0_11 = arith.constant 0 : index
    %c0_12 = arith.constant 0 : index
    %c0_13 = arith.constant 0 : index
    %16 = vector.load %arg4[%c0_11, %c0_12, %c0_13] : memref<3x16x16xf32, #tpu.memory_space<vmem>>, vector<1x16x16xf32>
    %17 = vector.shape_cast %16 : vector<1x16x16xf32> to vector<16x16xf32>
    %cst_14 = arith.constant dense<0.000000e+00> : vector<16x32xf32>
    %18 = tpu.matmul %17, %15, %cst_14 {dimension_numbers = #tpu.dot_dimension_numbers<[1], [0], [0], [1], [0, 0, 1, 1], [], []>} : vector<16x16xf32>, vector<16x32xf32>, vector<16x32xf32> -> vector<16x32xf32>
    %c0_15 = arith.constant 0 : index
    %c0_16 = arith.constant 0 : index
    %c0_17 = arith.constant 0 : index
    %19 = vector.load %arg5[%c0_15, %c0_16, %c0_17] : memref<3x32x128xf32, #tpu.memory_space<vmem>>, vector<1x32x128xf32>
    %20 = vector.shape_cast %19 : vector<1x32x128xf32> to vector<32x128xf32>
    %cst_18 = arith.constant dense<0.000000e+00> : vector<16x128xf32>
    %21 = tpu.matmul %18, %20, %cst_18 {dimension_numbers = #tpu.dot_dimension_numbers<[1], [0], [0], [1], [0, 0, 1, 1], [], []>} : vector<16x32xf32>, vector<32x128xf32>, vector<16x128xf32> -> vector<16x128xf32>
    %22 = arith.addf %3, %21 : vector<16x128xf32>
    %c1 = arith.constant 1 : index
    %c0_19 = arith.constant 0 : index
    %c0_20 = arith.constant 0 : index
    %23 = vector.load %arg2[%c1, %c0_19, %c0_20] : memref<3x32x32xf32, #tpu.memory_space<vmem>>, vector<1x32x32xf32>
    %24 = vector.shape_cast %23 : vector<1x32x32xf32> to vector<32x32xf32>
    %cst_21 = arith.constant dense<0.000000e+00> : vector<16x32xf32>
    %25 = tpu.matmul %0, %24, %cst_21 {dimension_numbers = #tpu.dot_dimension_numbers<[1], [0], [0], [1], [0, 0, 1, 1], [], []>} : vector<16x32xf32>, vector<32x32xf32>, vector<16x32xf32> -> vector<16x32xf32>
    %c1_22 = arith.constant 1 : index
    %c0_23 = arith.constant 0 : index
    %c0_24 = arith.constant 0 : index
    %26 = vector.load %arg3[%c1_22, %c0_23, %c0_24] : memref<3x1x32xf32, #tpu.memory_space<vmem>>, vector<1x1x32xf32>
    %27 = vector.shape_cast %26 : vector<1x1x32xf32> to vector<1x32xf32>
    %28 = vector.broadcast %27 : vector<1x32xf32> to vector<16x32xf32>
    %29 = arith.addf %25, %28 : vector<16x32xf32>
    %cst_25 = arith.constant 0.000000e+00 : f32
    %30 = vector.broadcast %cst_25 : f32 to vector<16x32xf32>
    %31 = arith.cmpf oge, %29, %30 : vector<16x32xf32>
    %cst_26 = arith.constant 0.00999999977 : f32
    %32 = vector.broadcast %cst_26 : f32 to vector<16x32xf32>
    %33 = arith.mulf %32, %29 : vector<16x32xf32>
    %34 = arith.select %31, %29, %33 : vector<16x32xi1>, vector<16x32xf32>
    %c1_27 = arith.constant 1 : index
    %c0_28 = arith.constant 0 : index
    %c0_29 = arith.constant 0 : index
    %35 = vector.load %arg4[%c1_27, %c0_28, %c0_29] : memref<3x16x16xf32, #tpu.memory_space<vmem>>, vector<1x16x16xf32>
    %36 = vector.shape_cast %35 : vector<1x16x16xf32> to vector<16x16xf32>
    %cst_30 = arith.constant dense<0.000000e+00> : vector<16x32xf32>
    %37 = tpu.matmul %36, %34, %cst_30 {dimension_numbers = #tpu.dot_dimension_numbers<[1], [0], [0], [1], [0, 0, 1, 1], [], []>} : vector<16x16xf32>, vector<16x32xf32>, vector<16x32xf32> -> vector<16x32xf32>
    %c1_31 = arith.constant 1 : index
    %c0_32 = arith.constant 0 : index
    %c0_33 = arith.constant 0 : index
    %38 = vector.load %arg5[%c1_31, %c0_32, %c0_33] : memref<3x32x128xf32, #tpu.memory_space<vmem>>, vector<1x32x128xf32>
    %39 = vector.shape_cast %38 : vector<1x32x128xf32> to vector<32x128xf32>
    %cst_34 = arith.constant dense<0.000000e+00> : vector<16x128xf32>
    %40 = tpu.matmul %37, %39, %cst_34 {dimension_numbers = #tpu.dot_dimension_numbers<[1], [0], [0], [1], [0, 0, 1, 1], [], []>} : vector<16x32xf32>, vector<32x128xf32>, vector<16x128xf32> -> vector<16x128xf32>
    %41 = arith.addf %22, %40 : vector<16x128xf32>
    %c2 = arith.constant 2 : index
    %c0_35 = arith.constant 0 : index
    %c0_36 = arith.constant 0 : index
    %42 = vector.load %arg2[%c2, %c0_35, %c0_36] : memref<3x32x32xf32, #tpu.memory_space<vmem>>, vector<1x32x32xf32>
    %43 = vector.shape_cast %42 : vector<1x32x32xf32> to vector<32x32xf32>
    %cst_37 = arith.constant dense<0.000000e+00> : vector<16x32xf32>
    %44 = tpu.matmul %0, %43, %cst_37 {dimension_numbers = #tpu.dot_dimension_numbers<[1], [0], [0], [1], [0, 0, 1, 1], [], []>} : vector<16x32xf32>, vector<32x32xf32>, vector<16x32xf32> -> vector<16x32xf32>
    %c2_38 = arith.constant 2 : index
    %c0_39 = arith.constant 0 : index
    %c0_40 = arith.constant 0 : index
    %45 = vector.load %arg3[%c2_38, %c0_39, %c0_40] : memref<3x1x32xf32, #tpu.memory_space<vmem>>, vector<1x1x32xf32>
    %46 = vector.shape_cast %45 : vector<1x1x32xf32> to vector<1x32xf32>
    %47 = vector.broadcast %46 : vector<1x32xf32> to vector<16x32xf32>
    %48 = arith.addf %44, %47 : vector<16x32xf32>
    %cst_41 = arith.constant 0.000000e+00 : f32
    %49 = vector.broadcast %cst_41 : f32 to vector<16x32xf32>
    %50 = arith.cmpf oge, %48, %49 : vector<16x32xf32>
    %cst_42 = arith.constant 0.00999999977 : f32
    %51 = vector.broadcast %cst_42 : f32 to vector<16x32xf32>
    %52 = arith.mulf %51, %48 : vector<16x32xf32>
    %53 = arith.select %50, %48, %52 : vector<16x32xi1>, vector<16x32xf32>
    %c2_43 = arith.constant 2 : index
    %c0_44 = arith.constant 0 : index
    %c0_45 = arith.constant 0 : index
    %54 = vector.load %arg4[%c2_43, %c0_44, %c0_45] : memref<3x16x16xf32, #tpu.memory_space<vmem>>, vector<1x16x16xf32>
    %55 = vector.shape_cast %54 : vector<1x16x16xf32> to vector<16x16xf32>
    %cst_46 = arith.constant dense<0.000000e+00> : vector<16x32xf32>
    %56 = tpu.matmul %55, %53, %cst_46 {dimension_numbers = #tpu.dot_dimension_numbers<[1], [0], [0], [1], [0, 0, 1, 1], [], []>} : vector<16x16xf32>, vector<16x32xf32>, vector<16x32xf32> -> vector<16x32xf32>
    %c2_47 = arith.constant 2 : index
    %c0_48 = arith.constant 0 : index
    %c0_49 = arith.constant 0 : index
    %57 = vector.load %arg5[%c2_47, %c0_48, %c0_49] : memref<3x32x128xf32, #tpu.memory_space<vmem>>, vector<1x32x128xf32>
    %58 = vector.shape_cast %57 : vector<1x32x128xf32> to vector<32x128xf32>
    %cst_50 = arith.constant dense<0.000000e+00> : vector<16x128xf32>
    %59 = tpu.matmul %56, %58, %cst_50 {dimension_numbers = #tpu.dot_dimension_numbers<[1], [0], [0], [1], [0, 0, 1, 1], [], []>} : vector<16x32xf32>, vector<32x128xf32>, vector<16x128xf32> -> vector<16x128xf32>
    %60 = arith.addf %41, %59 : vector<16x128xf32>
    %c0_51 = arith.constant 0 : index
    %c0_52 = arith.constant 0 : index
    %61 = vector.load %arg7[%c0_51, %c0_52] : memref<16x128xf32, #tpu.memory_space<vmem>>, vector<16x128xf32>
    tpu.vector_store %arg7[%c0_51, %c0_52], %60 {strides = array<i32>} : memref<16x128xf32, #tpu.memory_space<vmem>>, vector<16x128xf32>,
    return
  }
  func.func @transform_0(%arg0: i32) -> (i32, i32) {
    %c0_i32 = arith.constant 0 : i32
    %c0_i32_0 = arith.constant 0 : i32
    %c0_i32_1 = arith.constant 0 : i32
    return %c0_i32, %c0_i32_0 : i32, i32
  }
  func.func @transform_1(%arg0: i32) -> (i32, i32, i32) {
    %c0_i32 = arith.constant 0 : i32
    %c0_i32_0 = arith.constant 0 : i32
    %c0_i32_1 = arith.constant 0 : i32
    %c0_i32_2 = arith.constant 0 : i32
    return %c0_i32, %c0_i32_0, %c0_i32_1 : i32, i32, i32
  }
  func.func @transform_2(%arg0: i32) -> (i32, i32, i32) {
    %c0_i32 = arith.constant 0 : i32
    %c0_i32_0 = arith.constant 0 : i32
    %c0_i32_1 = arith.constant 0 : i32
    %c0_i32_2 = arith.constant 0 : i32
    return %c0_i32, %c0_i32_0, %c0_i32_1 : i32, i32, i32
  }
  func.func @transform_3(%arg0: i32) -> (i32, i32, i32) {
    %c0_i32 = arith.constant 0 : i32
    %c0_i32_0 = arith.constant 0 : i32
    %c0_i32_1 = arith.constant 0 : i32
    %c0_i32_2 = arith.constant 0 : i32
    return %c0_i32, %c0_i32_0, %c0_i32_1 : i32, i32, i32
  }
  func.func @transform_4(%arg0: i32) -> (i32, i32, i32) {
    %c0_i32 = arith.constant 0 : i32
    %c0_i32_0 = arith.constant 0 : i32
    %c0_i32_1 = arith.constant 0 : i32
    %c0_i32_2 = arith.constant 0 : i32
    return %c0_i32, %c0_i32_0, %c0_i32_1 : i32, i32, i32
  }
  func.func @transform_5(%arg0: i32) -> (i32, i32) {
    %c0_i32 = arith.constant 0 : i32
    %c0_i32_0 = arith.constant 0 : i32
    %c0_i32_1 = arith.constant 0 : i32
    return %c0_i32, %c0_i32_0 : i32, i32
  }
  func.func @transform_6(%arg0: i32) -> (i32, i32) {
    %c0_i32 = arith.constant 0 : i32
    %c0_i32_0 = arith.constant 0 : i32
    %c0_i32_1 = arith.constant 0 : i32
    return %c0_i32, %c0_i32_0 : i32, i32
  }
}

</mosaic_0001>

<bundles_post_ra>
// kernel: tpu_custom_call.1
= control target key start
LH: loop header
LB: loop body
LE: loop exit
PB: predicated region body
PF: predicated region fallthrough
CT: control target
= control target key end

     0   :  { %11 = vsyncpa [#allocation3], 0  ;;  %s1297_s0 = inlined_call_operand.hbm [shape: f32[16,32], index: 0, kind: input, shape index: {}]   ;;  %s1298_s1 = inlined_call_operand.hbm [shape: f32[3,32,32], index: 1, kind: input, shape index: {}]   ;;  %s1299_s2 = inlined_call_operand.vmem [shape: f32[3,1,32], index: 2, kind: input, shape index: {}]   ;;  %s1300_s3 = inlined_call_operand.hbm [shape: f32[3,16,16], index: 3, kind: input, shape index: {}]   ;;  %s1301_s4 = inlined_call_operand.hbm [shape: f32[3,32,128], index: 4, kind: input, shape index: {}]   ;;  %s1302_s5 = inlined_call_operand.vmem [shape: f32[1,128], index: 5, kind: input, shape index: {}]   ;;  %s1303_s6 = inlined_call_operand.hbm [shape: f32[16,128], index: 6, kind: output, shape index: {}]  }
   0x1   :  { %12 = vsyncpa [#allocation6], 0 }
   0x2   :  { %13 = vsyncpa [#allocation9], 0 }
   0x3   :  { %14 = vsyncpa [#allocation4], 0  ;;  %s1185_s21 = smov [#allocation5]   ;;  %s1186_s23 = smov [#allocation2]  }
   0x4   :  { %s32_s22 = sshll.u32 %s1185_s21, 4  ;;  %s20_s24 = sshll.u32 %s1186_s23, 4  ;;  %s33_s22 = int_to_ptr.vmem [resolvable:$true] %s32_s22  ;;  %s21_s24 = int_to_ptr.vmem [resolvable:$true] %s20_s24 }
   0x5   :  { %s1085_s25 = scalar_lea.vmem %s33_s22, 1536  ;;  %p1090_p1 = scmp.lt.s32.totalorder %s33_s22, %s33_s22 }
   0x6   :  { %p1086_p0 = scmp.ne.s32.totalorder %s33_s22, %s1085_s25  ;;  %p1091_p2 = scmp.lt.s32.totalorder %s1085_s25, %s1085_s25 }
   0x8   :  { %p1092_p3 = por %p1091_p2, %p1090_p1 }
   0xa   :  { %p1093_p4 = pnand %p1092_p3, %p1086_p0 }
   0xc   :  { %1096 = shalt.err (!%p1093_p4)
}
   0xd   :  { %s1187_s26 = smov 128   ;;  %s1188_s27 = smov 8  }
   0xe   :  { %38 = dma.hbm_to_vmem [thread:$0]  %s1298_s1, 1536, %s33_s22, [#allocation6], %s1187_s26, %s1187_s26, %s1188_s27  }
   0xf   :  { %s1105_s30 = scalar_lea.vmem %s21_s24, 256  ;;  %p1110_p6 = scmp.lt.s32.totalorder %s21_s24, %s21_s24 }
  0x10   :  { %p1106_p5 = scmp.ne.s32.totalorder %s21_s24, %s1105_s30  ;;  %p1111_p7 = scmp.lt.s32.totalorder %s1105_s30, %s1105_s30 }
  0x12   :  { %p1112_p8 = por %p1111_p7, %p1110_p6 }
  0x14   :  { %p1113_p9 = pnand %p1112_p8, %p1106_p5 }
  0x16   :  { %1116 = shalt.err (!%p1113_p9)
}
  0x17   :  { %26 = dma.hbm_to_vmem [thread:$0]  %s1297_s0, 256, %s21_s24, [#allocation3], %s1187_s26, %s1187_s26, %s1188_s27  }
  0x18   :  { %s1189_s9 = smov [#allocation7]   ;;  %s1190_s11 = smov [#allocation8]  }
  0x19   :  { %s46_s10 = sshll.u32 %s1189_s9, 4  ;;  %s58_s12 = sshll.u32 %s1190_s11, 4  ;;  %s47_s10 = int_to_ptr.vmem [resolvable:$true] %s46_s10  ;;  %s59_s12 = int_to_ptr.vmem [resolvable:$true] %s58_s12 }
  0x1a   :  { %s1125_s1 = scalar_lea.vmem %s47_s10, 768  ;;  %p1130_p11 = scmp.lt.s32.totalorder %s47_s10, %s47_s10 }
  0x1b   :  { %p1126_p10 = scmp.ne.s32.totalorder %s47_s10, %s1125_s1  ;;  %p1131_p12 = scmp.lt.s32.totalorder %s1125_s1, %s1125_s1 }
  0x1d   :  { %p1132_p13 = por %p1131_p12, %p1130_p11 }
  0x1f   :  { %p1133_p0 = pnand %p1132_p13, %p1126_p10 }
  0x21   :  { %1136 = shalt.err (!%p1133_p0)
}
  0x22   :  { %52 = dma.hbm_to_vmem [thread:$0]  %s1300_s3, 768, %s47_s10, [#allocation6], %s1187_s26, %s1187_s26, %s1188_s27  }
  0x23   :  { %s1145_s0 = scalar_lea.vmem %s59_s12, 1536  ;;  %p1150_p2 = scmp.lt.s32.totalorder %s59_s12, %s59_s12 }
  0x24   :  { %p1146_p1 = scmp.ne.s32.totalorder %s59_s12, %s1145_s0  ;;  %p1151_p3 = scmp.lt.s32.totalorder %s1145_s0, %s1145_s0 }
  0x26   :  { %p1152_p4 = por %p1151_p3, %p1150_p2 }
  0x28   :  { %p1153_p5 = pnand %p1152_p4, %p1146_p1 }
  0x2a   :  { %1156 = shalt.err (!%p1153_p5)
}
  0x2b   :  { %64 = dma.hbm_to_vmem [thread:$0]  %s1301_s4, 1536, %s59_s12, [#allocation9], %s1187_s26, %s1187_s26, %s1188_s27  }
  0x2c   :  { %1177 = dma.done.wait [#allocation3], 256  }
  0x2d   :  { %1178 = vsyncadd [#allocation3], 4294967040 }
  0x2e   :  { %1179 = dma.done.wait [#allocation6], 2304  }
  0x2f   :  { %1180 = vsyncadd [#allocation6], 4294964992 }
  0x30   :  { %1181 = dma.done.wait [#allocation9], 1536  }
  0x31   :  { %1182 = vsyncadd [#allocation9], 4294965760  ;;  %vm99_vm0 = vcmask 261120   ;;  %v91_v0 = vld [vmem:[#allocation5 + $0x18] sm:$0xff]  ;;  %v90_v1 = vld [vmem:[#allocation5 + $0x10] sm:$0xff]  ;;  %vm189_vm1 = vcmask 130048  }
  0x32   :  { %983 = vmatprep.subr.mxu0 %v91_v0  ;;  %v1251_v2 = vld [vmem:[#allocation2] sm:$0xff]  ;;  %v89_v3 = vld [vmem:[#allocation5 + $0x8] sm:$0xff]  ;;  %v88_v4 = vld [vmem:[#allocation5] sm:$0xff]  ;;  %s1191_s22 = smov [#allocation10]  }
  0x33   :  { %984 = vmatpush3.msra.mxu0 %v91_v0  ;;  %991 = vmatprep.mubr.msk.f32.mxu0 %vm99_vm0, %v1251_v2  ;;  %v1255_v5 = vld [vmem:[#allocation2 + $0x8] sm:$0xff]  ;;  %v361_v7 = vld [vmem:[#allocation5 + $0x30] sm:$0xff]  ;;  %v360_v8 = vld [vmem:[#allocation5 + $0x28] sm:$0xff]  ;;  %s897_s23 = sshll.u32 %s1191_s22, 4  ;;  %s898_s23 = int_to_ptr.vmem [resolvable:$true] %s897_s23 }
  0x34   :  { %985 = vmatprep.subr.mxu0 %v90_v1  ;;  %v362_v6 = vld [vmem:[#allocation5 + $0x38] sm:$0xff]  ;;  %v359_v9 = vld [vmem:[#allocation5 + $0x20] sm:$0xff]  ;;  %v912_v11 = vld [vmem:[%s1299_s2] ss:$0 sm:$0xff]  ;;  %p1162_p7 = scmp.lt.s32.totalorder %s898_s23, %s898_s23 }
  0x35   :  { %986 = vmatpush3.msra.mxu0 %v90_v1  ;;  %v187_v10 = vld [vmem:[#allocation7] sm:$0xff]  ;;  %v188_v20 = vld [vmem:[#allocation7 + $0x8] sm:$0xff]  ;;  %v272_v23 = vld [vmem:[#allocation8 + $0x8] sm:$0xff] }
  0x36   :  { %987 = vmatprep.subr.mxu0 %v89_v3  ;;  %998 = vmatprep.mubr.msk.f32.mxu1 %vm189_vm1, %v187_v10  ;;  %v274_v21 = vld [vmem:[#allocation8 + $0x18] sm:$0xff]  ;;  %v273_v22 = vld [vmem:[#allocation8 + $0x10] sm:$0xff]  ;;  %v271_v24 = vld [vmem:[#allocation8] sm:$0xff] }
  0x37   :  { %988 = vmatpush3.msra.mxu0 %v89_v3  ;;  %v920_v25 = vld [vmem:[%s1299_s2 + $0x1] ss:$0 sm:$0xff]  ;;  %v628_v37 = vld [vmem:[#allocation5 + $0x58] sm:$0xff]  ;;  %v626_v40 = vld [vmem:[#allocation5 + $0x48] sm:$0xff] }
  0x38   :  { %989 = vmatprep.subr.mxu0 %v88_v4  ;;  %v453_v35 = vld [vmem:[#allocation7 + $0x10] sm:$0xff]  ;;  %v454_v38 = vld [vmem:[#allocation7 + $0x18] sm:$0xff]  ;;  %v625_v41 = vld [vmem:[#allocation5 + $0x40] sm:$0xff] }
  0x39   :  { %990 = vmatpush3.msra.mxu0 %v88_v4  ;;  %v627_v39 = vld [vmem:[#allocation5 + $0x50] sm:$0xff]  ;;  %v540_v42 = vld [vmem:[#allocation8 + $0x38] sm:$0xff]  ;;  %v539_v43 = vld [vmem:[#allocation8 + $0x30] sm:$0xff] }
  0x3a   :  { %992 = vmatmul.mubr.msk.f32.vlgmr.msra.gmra.mxu0 %vm99_vm0, %v1255_v5  ;;  %1012 = vmatprep.subr.mxu0 %v362_v6  ;;  %v538_v44 = vld [vmem:[#allocation8 + $0x28] sm:$0xff]  ;;  %v537_v45 = vld [vmem:[#allocation8 + $0x20] sm:$0xff]  ;;  %v719_v50 = vld [vmem:[#allocation7 + $0x20] sm:$0xff] }
  0x3b   :  { %1013 = vmatpush3.msra.mxu0 %v362_v6  ;;  %1020 = vmatprep.mubr.msk.f32.mxu0 %vm99_vm0, %v1251_v2  ;;  %v928_v51 = vld [vmem:[%s1299_s2 + $0x2] ss:$0 sm:$0xff]  ;;  %v720_v60 = vld [vmem:[#allocation7 + $0x28] sm:$0xff]  ;;  %v805_v62 = vld [vmem:[#allocation8 + $0x50] sm:$0xff] }
  0x3c   :  { %1014 = vmatprep.subr.mxu0 %v361_v7  ;;  %v806_v61 = vld [vmem:[#allocation8 + $0x58] sm:$0xff]  ;;  %v804_v63 = vld [vmem:[#allocation8 + $0x48] sm:$0xff]  ;;  %v803_v0 = vld [vmem:[#allocation8 + $0x40] sm:$0xff] }
  0x3d   :  { %1015 = vmatpush3.msra.mxu0 %v361_v7  ;;  %v911_v1 = vld [vmem:[%s1302_s5] ss:$0 sm:$0xff]  ;;  %s1157_s5 = scalar_lea.vmem %s898_s23, 256 }
  0x3e   :  { %1016 = vmatprep.subr.mxu0 %v360_v8  ;;  %p1158_p6 = scmp.ne.s32.totalorder %s898_s23, %s1157_s5  ;;  %p1163_p8 = scmp.lt.s32.totalorder %s1157_s5, %s1157_s5 }
  0x3f   :  { %1017 = vmatpush3.msra.mxu0 %v360_v8 }
  0x40   :  { %1018 = vmatprep.subr.mxu0 %v359_v9  ;;  %p1164_p9 = por %p1163_p8, %p1162_p7 }
  0x41   :  { %1019 = vmatpush3.msra.mxu0 %v359_v9 }
  0x42   :  { %1021 = vmatmul.mubr.msk.f32.vlgmr.msra.gmra.mxu0 %vm99_vm0, %v1255_v5  ;;  %1030 = vmatprep.subr.mxu0 %v540_v42  ;;  %p1165_p10 = pnand %p1164_p9, %p1158_p6 }
  0x43   :  { %1031 = vmatpush3.msra.mxu0 %v540_v42 }
  0x44   :  { %1032 = vmatprep.subr.mxu0 %v539_v43 }
  0x45   :  { %1033 = vmatpush3.msra.mxu0 %v539_v43 }
  0x46   :  { %1034 = vmatprep.subr.mxu0 %v538_v44 }
  0x47   :  { %1035 = vmatpush3.msra.mxu0 %v538_v44 }
  0x48   :  { %1036 = vmatprep.subr.mxu0 %v537_v45 }
  0x49   :  { %1037 = vmatpush3.msra.mxu0 %v537_v45 }
  0xfa   :  { %v993_v12 = vpop.f32.mrf.mxu0 }
  0xfb   :  { %v178_v13 = vadd.f32 %v993_v12, %v912_v11 }
  0xfc   :  { %v172_v14 = vpop.f32.mrf.mxu0 }
  0xfd   :  { %v173_v15 = vadd.f32 %v912_v11, %v172_v14  ;;  %vm182_vm2 = vcmp.ge.f32.partialorder %v178_v13, 0.0  ;;  %v184_v16 = vmul.f32 0.01, %v178_v13 }
  0xff   :  { %v183_v17 = vmul.f32 0.01, %v173_v15  ;;  %v186_v18 = vsel %vm182_vm2, %v178_v13, %v184_v16  ;;  %vm181_vm3 = vcmp.ge.f32.partialorder %v173_v15, 0.0 }
 0x100   :  { %994 = vmatprep.subr.mxu1 %v186_v18 }
 0x101   :  { %995 = vmatpush3.msra.mxu1 %v186_v18  ;;  %v185_v19 = vsel %vm181_vm3, %v173_v15, %v183_v17 }
 0x102   :  { %996 = vmatprep.subr.mxu1 %v185_v19  ;;  %v1022_v26 = vpop.f32.mrf.mxu0 }
 0x103   :  { %997 = vmatpush3.msra.mxu1 %v185_v19  ;;  %v443_v27 = vadd.f32 %v1022_v26, %v920_v25 }
 0x104   :  { %999 = vmatmul.mubr.msk.f32.vlgmr.msra.gmra.mxu1 %vm189_vm1, %v188_v20  ;;  %1001 = vmatprep.subr.mxu1 %v274_v21  ;;  %v437_v30 = vpop.f32.mrf.mxu0 }
 0x105   :  { %1002 = vmatpush3.msra.mxu1 %v274_v21  ;;  %v449_v28 = vmul.f32 0.01, %v443_v27  ;;  %vm447_vm4 = vcmp.ge.f32.partialorder %v443_v27, 0.0  ;;  %v438_v31 = vadd.f32 %v920_v25, %v437_v30 }
 0x106   :  { %1003 = vmatprep.subr.mxu1 %v273_v22 }
 0x107   :  { %1004 = vmatpush3.msra.mxu1 %v273_v22  ;;  %v451_v29 = vsel %vm447_vm4, %v443_v27, %v449_v28  ;;  %v448_v33 = vmul.f32 0.01, %v438_v31  ;;  %vm446_vm5 = vcmp.ge.f32.partialorder %v438_v31, 0.0 }
 0x108   :  { %1005 = vmatprep.subr.mxu1 %v272_v23 }
 0x109   :  { %1006 = vmatpush3.msra.mxu1 %v272_v23  ;;  %v450_v36 = vsel %vm446_vm5, %v438_v31, %v448_v33 }
 0x10a   :  { %1007 = vmatprep.subr.mxu1 %v271_v24 }
 0x10b   :  { %1008 = vmatpush3.msra.mxu1 %v271_v24 }
 0x10c   :  { %1023 = vmatprep.subr.mxu1 %v451_v29 }
 0x1c4   :  { %v1000_v32 = vpop.f32.mrf.mxu1 }
 0x1c6   :  { %v262_v34 = vpop.f32.mrf.mxu1 }
 0x1c7   :  { %1009 = vmatprep.mubr.msk.f32.mxu1 %vm99_vm0, %v262_v34 }
 0x1c8   :  { %1010 = vmatmul.mubr.msk.f32.vlgmr.msra.gmra.mxu1 %vm99_vm0, %v1000_v32 }
 0x1c9   :  { %1024 = vmatpush3.msra.mxu1 %v451_v29  ;;  %1027 = vmatprep.mubr.msk.f32.mxu1 %vm189_vm1, %v453_v35 }
 0x1ca   :  { %1025 = vmatprep.subr.mxu1 %v450_v36 }
 0x1cb   :  { %1026 = vmatpush3.msra.mxu1 %v450_v36 }
 0x1cc   :  { %1041 = vmatprep.subr.mxu1 %v628_v37  ;;  %1028 = vmatmul.mubr.msk.f32.vlgmr.msra.gmra.mxu1 %vm189_vm1, %v454_v38 }
 0x1cd   :  { %1042 = vmatpush3.msra.mxu1 %v628_v37  ;;  %1049 = vmatprep.mubr.msk.f32.mxu1 %vm99_vm0, %v1251_v2 }
 0x1ce   :  { %1043 = vmatprep.subr.mxu1 %v627_v39 }
 0x1cf   :  { %1044 = vmatpush3.msra.mxu1 %v627_v39 }
 0x1d0   :  { %1045 = vmatprep.subr.mxu1 %v626_v40 }
 0x1d1   :  { %1046 = vmatpush3.msra.mxu1 %v626_v40 }
 0x1d2   :  { %1047 = vmatprep.subr.mxu1 %v625_v41 }
 0x1d3   :  { %1048 = vmatpush3.msra.mxu1 %v625_v41 }
 0x1d4   :  { %1050 = vmatmul.mubr.msk.f32.vlgmr.msra.gmra.mxu1 %vm99_vm0, %v1255_v5  ;;  %1059 = vmatprep.subr.mxu1 %v806_v61 }
 0x1d5   :  { %1060 = vmatpush3.msra.mxu1 %v806_v61 }
 0x1d6   :  { %1061 = vmatprep.subr.mxu1 %v805_v62 }
 0x1d7   :  { %1062 = vmatpush3.msra.mxu1 %v805_v62 }
 0x1d8   :  { %1063 = vmatprep.subr.mxu1 %v804_v63 }
 0x1d9   :  { %1064 = vmatpush3.msra.mxu1 %v804_v63 }
 0x1da   :  { %1065 = vmatprep.subr.mxu1 %v803_v0 }
 0x1db   :  { %1066 = vmatpush3.msra.mxu1 %v803_v0 }
 0x288   :  { %v1011_v46 = vpop.f32.mrf.mxu1 }
 0x289   :  { %v357_v2 = vadd.f32 %v1011_v46, %v911_v1 }
 0x28a   :  { %v347_v47 = vpop.f32.mrf.mxu1 }
 0x28b   :  { %v356_v4 = vadd.f32 %v911_v1, %v347_v47 }
 0x28c   :  { %v1029_v48 = vpop.f32.mrf.mxu1 }
 0x28e   :  { %v527_v49 = vpop.f32.mrf.mxu1 }
 0x28f   :  { %1038 = vmatprep.mubr.msk.f32.mxu0 %vm99_vm0, %v527_v49 }
 0x290   :  { %1039 = vmatmul.mubr.msk.f32.vlgmr.msra.gmra.mxu0 %vm99_vm0, %v1029_v48 }
 0x291   :  { %1056 = vmatprep.mubr.msk.f32.mxu0 %vm189_vm1, %v719_v50 }
 0x294   :  { %v1051_v52 = vpop.f32.mrf.mxu1 }
 0x295   :  { %v709_v53 = vadd.f32 %v1051_v52, %v928_v51 }
 0x296   :  { %v703_v54 = vpop.f32.mrf.mxu1 }
 0x297   :  { %v715_v55 = vmul.f32 0.01, %v709_v53  ;;  %v704_v56 = vadd.f32 %v928_v51, %v703_v54  ;;  %vm713_vm6 = vcmp.ge.f32.partialorder %v709_v53, 0.0 }
 0x299   :  { %v714_v57 = vmul.f32 0.01, %v704_v56  ;;  %v717_v58 = vsel %vm713_vm6, %v709_v53, %v715_v55  ;;  %vm712_vm7 = vcmp.ge.f32.partialorder %v704_v56, 0.0 }
 0x29a   :  { %1052 = vmatprep.subr.mxu0 %v717_v58 }
 0x29b   :  { %1053 = vmatpush3.msra.mxu0 %v717_v58  ;;  %v716_v59 = vsel %vm712_vm7, %v704_v56, %v714_v57 }
 0x29c   :  { %1054 = vmatprep.subr.mxu0 %v716_v59 }
 0x29d   :  { %1055 = vmatpush3.msra.mxu0 %v716_v59 }
 0x29e   :  { %1057 = vmatmul.mubr.msk.f32.vlgmr.msra.gmra.mxu0 %vm189_vm1, %v720_v60 }
 0x350   :  { %v1040_v3 = vpop.f32.mrf.mxu0 }
 0x351   :  { %v623_v5 = vadd.f32 %v1040_v3, %v357_v2 }
 0x352   :  { %v613_v6 = vpop.f32.mrf.mxu0 }
 0x353   :  { %v622_v7 = vadd.f32 %v613_v6, %v356_v4 }
 0x35e   :  { %v1058_v8 = vpop.f32.mrf.mxu0 }
 0x360   :  { %v793_v9 = vpop.f32.mrf.mxu0 }
 0x361   :  { %1067 = vmatprep.mubr.msk.f32.mxu1 %vm99_vm0, %v793_v9 }
 0x362   :  { %1068 = vmatmul.mubr.msk.f32.vlgmr.msra.gmra.mxu1 %vm99_vm0, %v1058_v8 }
 0x422   :  { %v1069_v10 = vpop.f32.mrf.mxu1 }
 0x423   :  { %v889_v11 = vadd.f32 %v1069_v10, %v623_v5 }
 0x424   :  { %v879_v12 = vpop.f32.mrf.mxu1 }
 0x425   :  { %891 = vst [vmem:[#allocation10 + $0x8] sm:$0xff] %v889_v11  ;;  %v888_v13 = vadd.f32 %v879_v12, %v622_v7 }
 0x427   :  { %890 = vst [vmem:[#allocation10] sm:$0xff] %v888_v13 }
 0x428   :  { %1168 = shalt.err (!%p1165_p10)
}
 0x429   :  { %903 = dma.vmem_to_hbm [thread:$0]  %s898_s23, 256, %s1303_s6, [#allocation4], %s1187_s26, %s1187_s26, %s1188_s27  }
 0x42a   :  { %1183 = dma.done.wait [#allocation4], 256  }
 0x42b   :  { %1184 = vsyncadd [#allocation4], 4294967040 }
 0x42c   :  { %907 = vsyncpa [#allocation3], 1 }
 0x42d   :  { %908 = vsyncpa [#allocation6], 1 }
 0x42e   :  { %909 = vsyncpa [#allocation9], 1 }
 0x42f   :  { %910 = vsyncpa [#allocation4], 1 }

</bundles_post_ra>
